<compile_context>
chip_gen: v7x
topology: tpu7x:2x2x1
jax: 0.10.0
libtpu: 0.0.40
codegen_flags: <defaults>
</compile_context>

<pallas_src>
import jax
import jax.numpy as jnp
from jax.experimental import pallas as pl
from jax.experimental.pallas import tpu as pltpu

_TM_ALIGN = 16                      # batch-tile alignment (covers f32 & bf16 packing)
_KT = 512                           # reduction tile when F is too large to keep resident
_K_RESIDENT_MAX = 2048              # keep full F in one block below this
_VMEM_TILE_BUDGET = 24 * 1024 * 1024  # conservative tile budget (fits v5e/v6e/v7x)
_VMEM_CAP = 64 * 1024 * 1024          # smallest physical VMEM across gens (v7x)


def _round_up(n, m):
    return ((n + m - 1) // m) * m


def ffnet_kernel(x_ref, w1_ref, b1_ref, w2_ref, b2_ref, o_ref, acc_ref):
    """One (batch-tile, F-reduction-tile) step of sigmoid(x@w1+b1) @ w2 + b2."""
    k = pl.program_id(1)

    @pl.when(k == 0)
    def _():
        acc_ref[...] = jnp.zeros_like(acc_ref)

    # Hidden-layer partial product on the MXU: bf16 operands, f32 accumulation.
    acc_ref[...] += jnp.dot(x_ref[...], w1_ref[...],
                            preferred_element_type=jnp.float32)

    @pl.when(k == pl.num_programs(1) - 1)
    def _():
        # Epilogue: bias + sigmoid (exp -> EUP slot), output layer, bias, store.
        h = jax.nn.sigmoid(acc_ref[...] + b1_ref[...])
        o = jnp.dot(h.astype(w2_ref.dtype), w2_ref[...],
                    preferred_element_type=jnp.float32)
        o_ref[...] = (o + b2_ref[...]).astype(o_ref.dtype)


def ffnet_forward(x, w1, b1, w2, b2, *, block_m=512, compute_dtype=jnp.bfloat16):
    """Fused FFNet forward.

    x:  [B, F]        w1: [F, H]   b1: [H] or [1, H]
    w2: [H, O]        b2: [O] or [1, O]          returns [B, O] float32.
    """
    B, F = x.shape
    H = w1.shape[1]
    n_out = w2.shape[1]

    # Defensive bias reshape (natural PyTorch export is 1-D).
    b1 = jnp.asarray(b1, jnp.float32).reshape(1, H)
    b2 = jnp.asarray(b2, jnp.float32).reshape(1, n_out)

    # bf16 operands for the MXU; accumulation stays f32 inside the kernel.
    x = x.astype(compute_dtype)
    w1 = w1.astype(compute_dtype)
    w2 = w2.astype(compute_dtype)
    op_bytes = jnp.dtype(compute_dtype).itemsize

    # --- Reduction (F) tiling ------------------------------------------------
    if F <= _K_RESIDENT_MAX:
        tk, F_pad = F, F                      # single reduction step, no F padding
    else:
        tk = _KT
        F_pad = _round_up(F, tk)

    # --- Batch (M) tiling ----------------------------------------------------
    block_m = max(_TM_ALIGN, _round_up(block_m, _TM_ALIGN))

    def footprint(tm):
        return (2 * tm * tk * op_bytes            # x tiles (double-buffered)
                + 2 * tk * H * op_bytes           # w1 tiles (double-buffered)
                + 2 * H * n_out * op_bytes        # w2 (resident, 2 bufs)
                + 2 * (H + n_out) * 4             # biases
                + 2 * tm * n_out * 4              # out tiles
                + tm * H * 4                      # f32 accumulator scratch
                + tm * H * (4 + op_bytes))        # sigmoid intermediate headroom

    while block_m > _TM_ALIGN and footprint(block_m) > _VMEM_TILE_BUDGET:
        block_m = max(_TM_ALIGN, _round_up(block_m // 2, _TM_ALIGN))

    # >= 2 batch steps when B allows it (lets "parallel" shard across v7x's two
    # TensorCores); balanced tm keeps batch padding to < 2*_TM_ALIGN rows.
    n_m = max(pl.cdiv(B, block_m), min(2, pl.cdiv(B, _TM_ALIGN)))
    tm = min(block_m, _round_up(pl.cdiv(B, n_m), _TM_ALIGN))
    B_pad = _round_up(B, tm)

    if B_pad != B or F_pad != F:
        x = jnp.pad(x, ((0, B_pad - B), (0, F_pad - F)))
    if F_pad != F:
        w1 = jnp.pad(w1, ((0, F_pad - F), (0, 0)))

    grid = (B_pad // tm, F_pad // tk)
    vmem_limit = int(min(_VMEM_CAP, max(2 * footprint(tm), 16 * 1024 * 1024)))

    out = pl.pallas_call(
        ffnet_kernel,
        out_shape=jax.ShapeDtypeStruct((B_pad, n_out), jnp.float32),
        grid_spec=pltpu.PrefetchScalarGridSpec(
            num_scalar_prefetch=0,
            grid=grid,
            in_specs=[
                # x: tiled over batch and reduction axes.
                pl.BlockSpec((tm, tk), lambda i, k: (i, k)),
                # w1: tiled over the reduction axis only.
                pl.BlockSpec((tk, H), lambda i, k: (k, 0)),
                # Biases / output weights: constant index_map -> DMA'd once,
                # VMEM-resident across all grid iterations.
                pl.BlockSpec((1, H), lambda i, k: (0, 0)),
                pl.BlockSpec((H, n_out), lambda i, k: (0, 0)),
                pl.BlockSpec((1, n_out), lambda i, k: (0, 0)),
            ],
            # Narrow (tm, n_out) output block: masked store, but no 64x HBM
            # writeback amplification from lane-padding n_out.
            out_specs=pl.BlockSpec((tm, n_out), lambda i, k: (i, 0)),
            scratch_shapes=[pltpu.VMEM((tm, H), jnp.float32)],
        ),
        compiler_params=pltpu.CompilerParams(
            dimension_semantics=("parallel", "arbitrary"),
            vmem_limit_bytes=vmem_limit,
        ),
    )(x, w1, b1, w2, b2)

    return out[:B]


def init_ffnet_params(key, n_features, n_hidden, n_out):
    """Mirrors FFNet.__init__: weights ~ N(0, 1); biases keep PyTorch Linear's
    default init U(-1/sqrt(fan_in), 1/sqrt(fan_in)).  Weights stored [in, out]."""
    k1, k2, k3, k4 = jax.random.split(key, 4)
    w1 = jax.random.normal(k1, (n_features, n_hidden), jnp.float32)
    w2 = jax.random.normal(k2, (n_hidden, n_out), jnp.float32)
    bound1 = 1.0 / (n_features ** 0.5)
    bound2 = 1.0 / (n_hidden ** 0.5)
    b1 = jax.random.uniform(k3, (n_hidden,), jnp.float32, -bound1, bound1)
    b2 = jax.random.uniform(k4, (n_out,), jnp.float32, -bound2, bound2)
    return w1, b1, w2, b2


if __name__ == "__main__":
    # Small shapes consistent with the module's (B, n_features) forward.
    batch, n_features, n_hidden, n_out = 8, 16, 32, 2

    key = jax.random.PRNGKey(0)
    kx, kp = jax.random.split(key)
    x = jax.random.normal(kx, (batch, n_features), jnp.float32)
    w1, b1, w2, b2 = init_ffnet_params(kp, n_features, n_hidden, n_out)

    out = ffnet_forward(x, w1, b1, w2, b2)
    out = jax.block_until_ready(out)

    # Pure-JAX f32 reference of the same forward pass (kernel uses bf16
    # operands with f32 accumulation, hence the loosened tolerance).
    ref = jax.nn.sigmoid(x @ w1 + b1) @ w2 + b2
    assert out.shape == (batch, n_out)
    assert jnp.allclose(out, ref, atol=5e-2, rtol=5e-2), (
        jnp.max(jnp.abs(out - ref)))

    print("KERNEL_OK")
</pallas_src>

<mosaic_0001>
module attributes {stable_mosaic.version = 11 : i64} {
  func.func @ffnet_kernel(%arg0: i32, %arg1: i32, %arg2: memref<16x16xbf16, #tpu.memory_space<vmem>>, %arg3: memref<16x32xbf16, #tpu.memory_space<vmem>>, %arg4: memref<1x32xf32, #tpu.memory_space<vmem>>, %arg5: memref<32x2xbf16, #tpu.memory_space<vmem>>, %arg6: memref<1x2xf32, #tpu.memory_space<vmem>>, %arg7: memref<16x2xf32, #tpu.memory_space<vmem>>, %arg8: memref<16x32xf32, #tpu.memory_space<vmem>>) attributes {dimension_semantics = [#tpu.dimension_semantics<parallel>, #tpu.dimension_semantics<arbitrary>], iteration_bounds = array<i64: 1, 1>, scalar_prefetch = 0 : i64, scratch_operands = 1 : i64, tpu.core_type = #tpu.core_type<tc>, window_params = [{transform_indices = @transform_0, window_bounds = array<i64: 16, 16>}, {transform_indices = @transform_1, window_bounds = array<i64: 16, 32>}, {pipeline_mode = #tpu.pipeline_mode<synchronous>, transform_indices = @transform_2, window_bounds = array<i64: 1, 32>}, {pipeline_mode = #tpu.pipeline_mode<synchronous>, transform_indices = @transform_3, window_bounds = array<i64: 32, 2>}, {pipeline_mode = #tpu.pipeline_mode<synchronous>, transform_indices = @transform_4, window_bounds = array<i64: 1, 2>}, {transform_indices = @transform_5, window_bounds = array<i64: 16, 2>}]} {
    %c0_i32 = arith.constant 0 : i32
    %0 = arith.cmpi eq, %arg1, %c0_i32 : i32
    %1 = arith.extui %0 : i1 to i32
    %c0_i32_0 = arith.constant 0 : i32
    %2 = arith.cmpi ne, %1, %c0_i32_0 : i32
    scf.if %2 {
      %cst_10 = arith.constant 0.000000e+00 : f32
      %12 = vector.broadcast %cst_10 : f32 to vector<16x32xf32>
      %c0_11 = arith.constant 0 : index
      %c0_12 = arith.constant 0 : index
      %13 = vector.load %arg8[%c0_11, %c0_12] : memref<16x32xf32, #tpu.memory_space<vmem>>, vector<16x32xf32>
      tpu.vector_store %arg8[%c0_11, %c0_12], %12 {strides = array<i32>} : memref<16x32xf32, #tpu.memory_space<vmem>>, vector<16x32xf32>,
    } else {
    }
    %c0 = arith.constant 0 : index
    %c0_1 = arith.constant 0 : index
    %3 = vector.load %arg8[%c0, %c0_1] : memref<16x32xf32, #tpu.memory_space<vmem>>, vector<16x32xf32>
    %c0_2 = arith.constant 0 : index
    %c0_3 = arith.constant 0 : index
    %4 = vector.load %arg2[%c0_2, %c0_3] : memref<16x16xbf16, #tpu.memory_space<vmem>>, vector<16x16xbf16>
    %c0_4 = arith.constant 0 : index
    %c0_5 = arith.constant 0 : index
    %5 = vector.load %arg3[%c0_4, %c0_5] : memref<16x32xbf16, #tpu.memory_space<vmem>>, vector<16x32xbf16>
    %cst = arith.constant dense<0.000000e+00> : vector<16x32xf32>
    %6 = tpu.matmul %4, %5, %cst {dimension_numbers = #tpu.dot_dimension_numbers<[1], [0], [0], [1], [0, 0, 1, 1], [], []>} : vector<16x16xbf16>, vector<16x32xbf16>, vector<16x32xf32> -> vector<16x32xf32>
    %7 = arith.addf %3, %6 : vector<16x32xf32>
    %c0_6 = arith.constant 0 : index
    %c0_7 = arith.constant 0 : index
    %8 = vector.load %arg8[%c0_6, %c0_7] : memref<16x32xf32, #tpu.memory_space<vmem>>, vector<16x32xf32>
    tpu.vector_store %arg8[%c0_6, %c0_7], %7 {strides = array<i32>} : memref<16x32xf32, #tpu.memory_space<vmem>>, vector<16x32xf32>,
    %c0_i32_8 = arith.constant 0 : i32
    %9 = arith.cmpi eq, %arg1, %c0_i32_8 : i32
    %10 = arith.extui %9 : i1 to i32
    %c0_i32_9 = arith.constant 0 : i32
    %11 = arith.cmpi ne, %10, %c0_i32_9 : i32
    scf.if %11 {
      %c0_10 = arith.constant 0 : index
      %c0_11 = arith.constant 0 : index
      %12 = vector.load %arg8[%c0_10, %c0_11] : memref<16x32xf32, #tpu.memory_space<vmem>>, vector<16x32xf32>
      %c0_12 = arith.constant 0 : index
      %c0_13 = arith.constant 0 : index
      %13 = vector.load %arg4[%c0_12, %c0_13] : memref<1x32xf32, #tpu.memory_space<vmem>>, vector<1x32xf32>
      %14 = vector.broadcast %13 : vector<1x32xf32> to vector<16x32xf32>
      %15 = arith.addf %12, %14 : vector<16x32xf32>
      %16 = arith.negf %15 : vector<16x32xf32>
      %17 = math.exp %16 : vector<16x32xf32>
      %cst_14 = arith.constant 1.000000e+00 : f32
      %18 = vector.broadcast %cst_14 : f32 to vector<16x32xf32>
      %19 = arith.addf %18, %17 : vector<16x32xf32>
      %20 = arith.divf %18, %19 : vector<16x32xf32>
      %21 = arith.truncf %20 : vector<16x32xf32> to vector<16x32xbf16>
      %c0_15 = arith.constant 0 : index
      %c0_16 = arith.constant 0 : index
      %22 = vector.load %arg5[%c0_15, %c0_16] : memref<32x2xbf16, #tpu.memory_space<vmem>>, vector<32x2xbf16>
      %cst_17 = arith.constant dense<0.000000e+00> : vector<16x2xf32>
      %23 = tpu.matmul %21, %22, %cst_17 {dimension_numbers = #tpu.dot_dimension_numbers<[1], [0], [0], [1], [0, 0, 1, 1], [], []>} : vector<16x32xbf16>, vector<32x2xbf16>, vector<16x2xf32> -> vector<16x2xf32>
      %c0_18 = arith.constant 0 : index
      %c0_19 = arith.constant 0 : index
      %24 = vector.load %arg6[%c0_18, %c0_19] : memref<1x2xf32, #tpu.memory_space<vmem>>, vector<1x2xf32>
      %25 = vector.broadcast %24 : vector<1x2xf32> to vector<16x2xf32>
      %26 = arith.addf %23, %25 : vector<16x2xf32>
      %c0_20 = arith.constant 0 : index
      %c0_21 = arith.constant 0 : index
      %27 = vector.load %arg7[%c0_20, %c0_21] : memref<16x2xf32, #tpu.memory_space<vmem>>, vector<16x2xf32>
      tpu.vector_store %arg7[%c0_20, %c0_21], %26 {strides = array<i32>} : memref<16x2xf32, #tpu.memory_space<vmem>>, vector<16x2xf32>,
    } else {
    }
    return
  }
  func.func @transform_0(%arg0: i32, %arg1: i32) -> (i32, i32) {
    %c0_i32 = arith.constant 0 : i32
    return %arg0, %arg1 : i32, i32
  }
  func.func @transform_1(%arg0: i32, %arg1: i32) -> (i32, i32) {
    %c0_i32 = arith.constant 0 : i32
    %c0_i32_0 = arith.constant 0 : i32
    return %arg1, %c0_i32 : i32, i32
  }
  func.func @transform_2(%arg0: i32, %arg1: i32) -> (i32, i32) {
    %c0_i32 = arith.constant 0 : i32
    %c0_i32_0 = arith.constant 0 : i32
    %c0_i32_1 = arith.constant 0 : i32
    return %c0_i32, %c0_i32_0 : i32, i32
  }
  func.func @transform_3(%arg0: i32, %arg1: i32) -> (i32, i32) {
    %c0_i32 = arith.constant 0 : i32
    %c0_i32_0 = arith.constant 0 : i32
    %c0_i32_1 = arith.constant 0 : i32
    return %c0_i32, %c0_i32_0 : i32, i32
  }
  func.func @transform_4(%arg0: i32, %arg1: i32) -> (i32, i32) {
    %c0_i32 = arith.constant 0 : i32
    %c0_i32_0 = arith.constant 0 : i32
    %c0_i32_1 = arith.constant 0 : i32
    return %c0_i32, %c0_i32_0 : i32, i32
  }
  func.func @transform_5(%arg0: i32, %arg1: i32) -> (i32, i32) {
    %c0_i32 = arith.constant 0 : i32
    %c0_i32_0 = arith.constant 0 : i32
    return %arg0, %c0_i32 : i32, i32
  }
}

</mosaic_0001>

<bundles_post_ra>
// kernel: tpu_custom_call.1
= control target key start
LH: loop header
LB: loop body
LE: loop exit
PB: predicated region body
PF: predicated region fallthrough
CT: control target
= control target key end

     0   :  { %vm25_vm0 = vcmask 261120   ;;  %v239_v0 = vmov 0.0   ;;  %vm240_vm1 = vmmov 0   ;;  %vm45_vm2 = vcmask 130048   ;;  %s300_s1 = inlined_call_operand.vmem [shape: bf16[16,32], index: 1, kind: input, shape index: {}]   ;;  %s301_s0 = inlined_call_operand.vmem [shape: bf16[16,16], index: 0, kind: input, shape index: {}]   ;;  %s302_s3 = inlined_call_operand.vmem [shape: bf16[32,2], index: 3, kind: input, shape index: {}]   ;;  %s303_s2 = inlined_call_operand.vmem [shape: f32[1,32], index: 2, kind: input, shape index: {}]   ;;  %s304_s4 = inlined_call_operand.vmem [shape: f32[1,2], index: 4, kind: input, shape index: {}]   ;;  %s305_s5 = inlined_call_operand.vmem [shape: f32[16,2], index: 5, kind: output, shape index: {}]  }
   0x1   :  { %211 = vmatprep.subr.bf16.mxu0 %v239_v0  ;;  %v227_v1 = vld [vmem:[%s300_s1] sm:$0xff]   ;;  %213 = vmatprep.mubr.msk.bf16.mxu0 %vm240_vm1, %v239_v0  ;;  %26 = vst.msk [vmem:[#allocation2] sm:$0xff] %vm25_vm0, %v239_v0  ;;  %27 = vst.msk [vmem:[#allocation2 + $0x8] sm:$0xff] %vm25_vm0, %v239_v0  ;;  %v230_v4 = vld [vmem:[%s302_s3 + $0x8] sm:$0xff]   ;;  %vm189_vm3 = vcmask 15360  }
   0x2   :  { %v228_v2 = vld [vmem:[%s301_s0] sm:$0xff]   ;;  %217 = vmatprep.subr.bf16.mxu1 %v239_v0  ;;  %221 = vmatprep.mubr.msk.bf16.mxu1 %vm240_vm1, %v239_v0 }
   0x3   :  { %212 = vmatpush3.bf16.msra.mxu0 %v227_v1  ;;  %v229_v3 = vld [vmem:[%s302_s3] sm:$0xff]  }
   0x4   :  { %218 = vmatpush3.bf16.msra.mxu1 %v229_v3  ;;  %v199_v13 = vld [vmem:[%s303_s2] ss:$0 sm:$0xff] }
   0x5   :  { %219 = vmatprep.subr.bf16.mxu1 %v239_v0  ;;  %v202_v27 = vld [vmem:[%s304_s4] ss:$0 sm:$0xff] }
   0x6   :  { %214 = vmatmul.mubr.msk.bf16.vlgmr.msra.gmra.mrb[0].mxu0 %vm45_vm2, %v228_v2 }
   0x8   :  { %220 = vmatpush3.bf16.msra.mxu1 %v230_v4  ;;  %v28_v5 = vld [vmem:[#allocation2] sm:$0xff]  ;;  %v29_v7 = vld [vmem:[#allocation2 + $0x8] sm:$0xff] }
  0xd9   :  { %v83_v6 = vpop.f32.mrb[0].mxu0 }
  0xda   :  { %v90_v8 = vadd.f32 %v83_v6, %v28_v5  ;;  %v215_v9 = vpop.f32.mrb[1].mxu0 }
  0xdb   :  { %v86_v10 = vpop.f32.mrb[2].mxu0 }
  0xdc   :  { %93 = vst.msk [vmem:[#allocation2] sm:$0xff] %vm25_vm0, %v90_v8  ;;  %v91_v11 = vadd.f32 %v86_v10, %v29_v7  ;;  %v216_v12 = vpop.f32.mrb[3].mxu0 }
  0xde   :  { %94 = vst.msk [vmem:[#allocation2 + $0x8] sm:$0xff] %vm25_vm0, %v91_v11 }
  0xe3   :  { %v98_v14 = vld [vmem:[#allocation2] sm:$0xff] }
  0xe4   :  { %v107_v15 = vadd.f32 %v199_v13, %v98_v14 }
  0xe5   :  { %v99_v16 = vld [vmem:[#allocation2 + $0x8] sm:$0xff] }
  0xe6   :  { %v108_v17 = vadd.f32 %v199_v13, %v99_v16  ;;  %v200_v18 = vmul.f32 -1.442695, %v107_v15 }
  0xe8   :  { %231 = vpow2.f32 %v200_v18  ;;  %v201_v19 = vmul.f32 -1.442695, %v108_v17 }
  0xea   :  { %233 = vpow2.f32 %v201_v19 }
  0xf2   :  { %v232_v20 = vpop.eup %231 }
  0xf3   :  { %v115_v21 = vadd.f32 1.0, %v232_v20 }
  0xf4   :  { %v234_v22 = vpop.eup %233 }
  0xf5   :  { %v116_v23 = vadd.f32 1.0, %v234_v22  ;;  %235 = vrcp.f32 %v115_v21 }
  0xf7   :  { %237 = vrcp.f32 %v116_v23 }
  0xff   :  { %v236_v24 = vpop.eup %235 }
 0x101   :  { %v238_v25 = vpop.eup %237 }
 0x102   :  { %v121_v26 = vpack.c.bf16 %v238_v25, %v236_v24 }
 0x104   :  { %222 = vmatmul.mubr.msk.bf16.vlgmr.msra.gmra.mrb[0].mxu1 %vm25_vm0, %v121_v26 }
 0x1d7   :  { %v182_v28 = vpop.f32.mrb[0].mxu1 }
 0x1d8   :  { %v183_v29 = vadd.f32 %v202_v27, %v182_v28  ;;  %v223_v30 = vpop.f32.mrb[1].mxu1 }
 0x1d9   :  { %v185_v31 = vpop.f32.mrb[2].mxu1 }
 0x1da   :  { %190 = vst.msk [vmem:[%s305_s5] sm:$0xff] %vm189_vm3, %v183_v29  ;;  %v186_v32 = vadd.f32 %v202_v27, %v185_v31  ;;  %v224_v33 = vpop.f32.mrb[3].mxu1 }
 0x1dc   :  { %191 = vst.msk [vmem:[%s305_s5 + $0x8] sm:$0xff] %vm189_vm3, %v186_v32 }

</bundles_post_ra>
